<compile_context>
chip_gen: v6e
topology: v6e:2x2x1
jax: 0.10.0
libtpu: 0.0.40
codegen_flags: <defaults>
</compile_context>

<pallas_src>
import functools
from collections import OrderedDict

import jax
import jax.numpy as jnp
from jax import lax
from jax.experimental import pallas as pl
from jax.experimental.pallas import tpu as pltpu  # noqa: F401  (TPU backend)

# Fixed model dimensions of the synthetic pretrained CNN.
KH, KW = 3, 3
C_IN, C_OUT = 4, 8
FC_OUT = 10


# ----------------------------- Pallas kernel -----------------------------

def _full_spec(shape):
    """Single block covering the whole (small) array."""
    ndim = len(shape)
    return pl.BlockSpec(shape, lambda: (0,) * ndim)


def _fused_forward_kernel(xp_ref, wbig_ref, cbias_ref, a_ref, spk_ref, bpk_ref,
                          conv_ref, pk_ref, *, n, h, w, c_out, kcols):
    """pad-conv(+bias) -> relu -> global-avg-pool -> fc, all in one kernel.

    xp    : (N, H+2, (W+2)*Cin)  padded NHWC input, last two dims merged
    wbig  : (KH*(W+2)*Cin, Cout*W)  Toeplitz conv weight (co-major lanes)
    cbias : (1, Cout*W)             conv bias repeated over w
    a     : (N, N*H)                per-batch row mean (1/(H*W) folded in)
    spk   : (Cout*W, Cout+FC_OUT)   [s_sum | s_sum @ fc_w]
    bpk   : (1, Cout+FC_OUT)        [0 | fc_b]

    conv  : (N, Cout, H, W)         'conv' hook output, NCHW, pre-ReLU
    pk    : (N, Cout+FC_OUT)        packed [pooled | fc_out]
    """
    wb = wbig_ref[...]            # load the Toeplitz weight once (216, 128)
    cb = cbias_ref[...]           # (1, Cout*W)

    convs = []
    for n_i in range(n):          # static unrolled loop over the tiny batch
        xb = xp_ref[n_i]          # (H+2, (W+2)*Cin), one VMEM load per image
        # im2col-free conv: KH shifted-row dots against the K-chunks of wbig.
        acc = jnp.dot(xb[0:h, :], wb[0:kcols, :],
                      preferred_element_type=jnp.float32)
        for kh in range(1, KH):
            acc = acc + jnp.dot(xb[kh:kh + h, :],
                                wb[kh * kcols:(kh + 1) * kcols, :],
                                preferred_element_type=jnp.float32)
        conv_n = acc + cb                       # (H, Cout*W), lane = co*W + w

        # 'conv' hook written directly in NCHW: co-major lanes make each
        # (n, co) plane a contiguous static lane slice.
        for co in range(c_out):
            conv_ref[n_i, co, :, :] = conv_n[:, co * w:(co + 1) * w]
        convs.append(conv_n)

    # ReLU + pool/fc tail (re-associated): ar = a_sum @ relu(conv) first,
    # then a single packed tail dot produces [pooled | fc_out].
    r = jnp.maximum(jnp.concatenate(convs, axis=0), 0.0)        # (N*H, Cout*W)
    ar = jnp.dot(a_ref[...], r, preferred_element_type=jnp.float32)  # (N, Cout*W)
    pk_ref[...] = (jnp.dot(ar, spk_ref[...],
                           preferred_element_type=jnp.float32) + bpk_ref[...])


def fused_forward(xp3, wbig, cbias, a_sum, s_packed, b_packed, *, n, h, w):
    c_out = C_OUT
    pk_w = b_packed.shape[1]                 # Cout + FC_OUT
    kcols = xp3.shape[2]                     # (W+2)*Cin
    kernel = functools.partial(_fused_forward_kernel,
                               n=n, h=h, w=w, c_out=c_out, kcols=kcols)
    # Single full-array block: at this size everything is tens of KiB of VMEM.
    # When scaling batch/spatial, grid over M = N*H ("parallel" for v7x's two
    # TensorCores) and re-derive block sizes against the 64 MiB v7x VMEM.
    return pl.pallas_call(
        kernel,
        out_shape=(jax.ShapeDtypeStruct((n, c_out, h, w), jnp.float32),  # conv hook (NCHW)
                   jax.ShapeDtypeStruct((n, pk_w), jnp.float32)),        # [pooled | fc]
        in_specs=[_full_spec(xp3.shape), _full_spec(wbig.shape),
                  _full_spec(cbias.shape), _full_spec(a_sum.shape),
                  _full_spec(s_packed.shape), _full_spec(b_packed.shape)],
        out_specs=(_full_spec((n, c_out, h, w)), _full_spec((n, pk_w))),
    )(xp3, wbig, cbias, a_sum, s_packed, b_packed)


# ----------------------------- Parameters -----------------------------

def init_params(key, c_in=C_IN, c_out=C_OUT, kh=KH, kw=KW, fc_out=FC_OUT):
    """Conv weight is stored in GEMM layout (kh*kw*Cin, Cout); row ordering is
    (kh, kw, Cin). Real PyTorch weights (Cout, Cin, kh, kw) would need a
    permute/reshape to this layout."""
    k1, k2, k3, k4 = jax.random.split(key, 4)
    conv_w = 0.1 * jax.random.normal(k1, (kh * kw * c_in, c_out), jnp.float32)
    conv_b = 0.1 * jax.random.normal(k2, (c_out,), jnp.float32)
    fc_w = 0.1 * jax.random.normal(k3, (c_out, fc_out), jnp.float32)
    fc_b = 0.1 * jax.random.normal(k4, (fc_out,), jnp.float32)
    return dict(conv_w=conv_w, conv_b=conv_b, fc_w=fc_w, fc_b=fc_b)


def preprocess_params(params, n, h, w):
    """One-time weight preprocessing into kernel-ready constants.
    NOTE: a_sum / wbig bake in (n, h, w); regenerate for other input shapes.
    TODO(synk): for large W, replace the ~17%-dense Toeplitz wbig with
    per-tap accumulated GEMMs to avoid wasted MXU MACs and O(W^2) VMEM."""
    c_in, c_out = C_IN, C_OUT
    w4 = params["conv_w"].reshape(KH, KW, c_in, c_out).astype(jnp.float32)

    # Toeplitz conv weight. Rows ordered (kh, wp, ci) so the kernel's per-kh
    # K-chunks are contiguous; lanes ordered (co, w) (co-major) so the NCHW
    # hook write is a contiguous lane slice per output channel.
    wp_idx = jnp.arange(w + 2)[:, None]          # padded-width position
    w_idx = jnp.arange(w)[None, :]               # output-width position
    j = wp_idx - w_idx
    valid = ((j >= 0) & (j < KW)).astype(jnp.float32)
    jc = jnp.clip(j, 0, KW - 1)
    wbig5 = w4[:, jc, :, :] * valid[None, :, :, None, None]   # (KH, W+2, W, Cin, Cout)
    wbig = jnp.transpose(wbig5, (0, 1, 3, 4, 2)).reshape(
        KH * (w + 2) * c_in, c_out * w)

    # Conv bias in the co-major lane layout.
    cbias_ld = jnp.repeat(params["conv_b"].astype(jnp.float32), w).reshape(1, c_out * w)

    # Per-batch row mean (1/(H*W) folded here): ar = a_sum @ relu(conv).
    a_sum = jnp.kron(jnp.eye(n, dtype=jnp.float32),
                     jnp.full((1, h), 1.0 / (h * w), jnp.float32))   # (N, N*H)

    # Lane-group (w) sum, co-major; fc folded into the same packed tail matrix.
    s_sum = jnp.kron(jnp.eye(c_out, dtype=jnp.float32),
                     jnp.ones((w, 1), jnp.float32))                  # (Cout*W, Cout)
    s_fc = s_sum @ params["fc_w"].astype(jnp.float32)                # (Cout*W, FC_OUT)
    s_packed = jnp.concatenate([s_sum, s_fc], axis=1)                # (Cout*W, Cout+FC_OUT)
    b_packed = jnp.concatenate(
        [jnp.zeros((1, c_out), jnp.float32),
         params["fc_b"].reshape(1, FC_OUT).astype(jnp.float32)], axis=1)

    return dict(wbig=wbig, cbias_ld=cbias_ld, a_sum=a_sum,
                s_packed=s_packed, b_packed=b_packed)


# ----------------------------- Forward (hook semantics) -----------------------------

@functools.partial(jax.jit, static_argnames=("output_layers",))
def forward_hook_model(prep, x_nchw, output_layers=(0, 2)):
    """Mirrors ForwardHookModel.forward: returns (out, {layer_name: output})."""
    layer_names = ("conv", "relu", "pool", "fc")
    n, c, h, w = x_nchw.shape

    # Only wrapper preprocessing left: NHWC transpose + SAME pad + merge the
    # last two dims (one fused XLA op, ~10 KiB). No strip/im2col tensor.
    x_nhwc = jnp.transpose(x_nchw, (0, 2, 3, 1))
    xp = jnp.pad(x_nhwc, ((0, 0), (1, 1), (1, 1), (0, 0)))
    xp3 = xp.reshape(n, h + 2, (w + 2) * c)

    conv_nchw, packed = fused_forward(
        xp3, prep["wbig"], prep["cbias_ld"], prep["a_sum"],
        prep["s_packed"], prep["b_packed"], n=n, h=h, w=w)
    pooled = packed[:, :C_OUT]      # cheap static slices of the packed slab
    out = packed[:, C_OUT:]

    selected = OrderedDict()
    if 0 in output_layers:   # 'conv' hook: pre-ReLU conv output, NCHW (from kernel)
        selected[layer_names[0]] = conv_nchw
    if 1 in output_layers:   # 'relu' hook (not on default path)
        selected[layer_names[1]] = jnp.maximum(conv_nchw, 0.0)
    if 2 in output_layers:   # 'pool' hook
        selected[layer_names[2]] = pooled
    if 3 in output_layers:   # 'fc' hook
        selected[layer_names[3]] = out
    return out, selected


# ----------------------------- Driver -----------------------------

if __name__ == "__main__":
    key = jax.random.PRNGKey(0)
    kp, kx = jax.random.split(key)
    params = init_params(kp)

    N, H, W = 2, 16, 16
    x = jax.random.normal(kx, (N, C_IN, H, W), jnp.float32)

    prep = preprocess_params(params, N, H, W)
    out, selected = forward_hook_model(prep, x, output_layers=(0, 2))
    out = jax.block_until_ready(out)
    for v in selected.values():
        jax.block_until_ready(v)

    assert out.shape == (N, FC_OUT)
    assert selected["conv"].shape == (N, C_OUT, H, W)
    assert selected["pool"].shape == (N, C_OUT)

    # Pure-JAX reference check (lax.conv) of the fused kernel.
    x_nhwc = jnp.transpose(x, (0, 2, 3, 1))
    w_hwio = params["conv_w"].reshape(KH, KW, C_IN, C_OUT)
    ref_conv = lax.conv_general_dilated(
        x_nhwc, w_hwio, window_strides=(1, 1), padding="SAME",
        dimension_numbers=("NHWC", "HWIO", "NHWC")) + params["conv_b"]
    ref_relu = jnp.maximum(ref_conv, 0.0)
    ref_pool = jnp.mean(ref_relu, axis=(1, 2))
    ref_out = ref_pool @ params["fc_w"] + params["fc_b"]

    assert jnp.allclose(selected["conv"],
                        jnp.transpose(ref_conv, (0, 3, 1, 2)), atol=1e-4, rtol=1e-4)
    assert jnp.allclose(selected["pool"], ref_pool, atol=1e-4, rtol=1e-4)
    assert jnp.allclose(out, ref_out, atol=1e-4, rtol=1e-4)

    print("KERNEL_OK")
</pallas_src>

<mosaic_0001>
module attributes {stable_mosaic.version = 11 : i64} {
  func.func @_fused_forward_kernel(%arg0: memref<2x18x72xf32, #tpu.memory_space<vmem>>, %arg1: memref<216x128xf32, #tpu.memory_space<vmem>>, %arg2: memref<1x128xf32, #tpu.memory_space<vmem>>, %arg3: memref<2x32xf32, #tpu.memory_space<vmem>>, %arg4: memref<128x18xf32, #tpu.memory_space<vmem>>, %arg5: memref<1x18xf32, #tpu.memory_space<vmem>>, %arg6: memref<2x8x16x16xf32, #tpu.memory_space<vmem>>, %arg7: memref<2x18xf32, #tpu.memory_space<vmem>>) attributes {dimension_semantics = [], scalar_prefetch = 0 : i64, scratch_operands = 0 : i64, tpu.core_type = #tpu.core_type<tc>} {
    %c0 = arith.constant 0 : index
    %c0_0 = arith.constant 0 : index
    %0 = vector.load %arg1[%c0, %c0_0] : memref<216x128xf32, #tpu.memory_space<vmem>>, vector<216x128xf32>
    %c0_1 = arith.constant 0 : index
    %c0_2 = arith.constant 0 : index
    %1 = vector.load %arg2[%c0_1, %c0_2] : memref<1x128xf32, #tpu.memory_space<vmem>>, vector<1x128xf32>
    %c0_3 = arith.constant 0 : index
    %c0_4 = arith.constant 0 : index
    %c0_5 = arith.constant 0 : index
    %2 = vector.load %arg0[%c0_3, %c0_4, %c0_5] : memref<2x18x72xf32, #tpu.memory_space<vmem>>, vector<1x18x72xf32>
    %3 = vector.shape_cast %2 : vector<1x18x72xf32> to vector<18x72xf32>
    %4 = vector.extract_strided_slice %3 {offsets = [0, 0], sizes = [16, 72], strides = [1, 1]} : vector<18x72xf32> to vector<16x72xf32>
    %5 = vector.extract_strided_slice %0 {offsets = [0, 0], sizes = [72, 128], strides = [1, 1]} : vector<216x128xf32> to vector<72x128xf32>
    %cst = arith.constant dense<0.000000e+00> : vector<16x128xf32>
    %6 = tpu.matmul %4, %5, %cst {dimension_numbers = #tpu.dot_dimension_numbers<[1], [0], [0], [1], [0, 0, 1, 1], [], []>} : vector<16x72xf32>, vector<72x128xf32>, vector<16x128xf32> -> vector<16x128xf32>
    %7 = vector.extract_strided_slice %3 {offsets = [1, 0], sizes = [16, 72], strides = [1, 1]} : vector<18x72xf32> to vector<16x72xf32>
    %8 = vector.extract_strided_slice %0 {offsets = [72, 0], sizes = [72, 128], strides = [1, 1]} : vector<216x128xf32> to vector<72x128xf32>
    %cst_6 = arith.constant dense<0.000000e+00> : vector<16x128xf32>
    %9 = tpu.matmul %7, %8, %cst_6 {dimension_numbers = #tpu.dot_dimension_numbers<[1], [0], [0], [1], [0, 0, 1, 1], [], []>} : vector<16x72xf32>, vector<72x128xf32>, vector<16x128xf32> -> vector<16x128xf32>
    %10 = arith.addf %6, %9 : vector<16x128xf32>
    %11 = vector.extract_strided_slice %3 {offsets = [2, 0], sizes = [16, 72], strides = [1, 1]} : vector<18x72xf32> to vector<16x72xf32>
    %12 = vector.extract_strided_slice %0 {offsets = [144, 0], sizes = [72, 128], strides = [1, 1]} : vector<216x128xf32> to vector<72x128xf32>
    %cst_7 = arith.constant dense<0.000000e+00> : vector<16x128xf32>
    %13 = tpu.matmul %11, %12, %cst_7 {dimension_numbers = #tpu.dot_dimension_numbers<[1], [0], [0], [1], [0, 0, 1, 1], [], []>} : vector<16x72xf32>, vector<72x128xf32>, vector<16x128xf32> -> vector<16x128xf32>
    %14 = arith.addf %10, %13 : vector<16x128xf32>
    %15 = vector.broadcast %1 : vector<1x128xf32> to vector<16x128xf32>
    %16 = arith.addf %14, %15 : vector<16x128xf32>
    %17 = vector.extract_strided_slice %16 {offsets = [0, 0], sizes = [16, 16], strides = [1, 1]} : vector<16x128xf32> to vector<16x16xf32>
    %c0_8 = arith.constant 0 : index
    %c0_9 = arith.constant 0 : index
    %c0_10 = arith.constant 0 : index
    %c0_11 = arith.constant 0 : index
    %18 = vector.load %arg6[%c0_8, %c0_9, %c0_10, %c0_11] : memref<2x8x16x16xf32, #tpu.memory_space<vmem>>, vector<1x1x16x16xf32>
    %19 = vector.shape_cast %18 : vector<1x1x16x16xf32> to vector<16x16xf32>
    %20 = vector.shape_cast %17 : vector<16x16xf32> to vector<1x1x16x16xf32>
    tpu.vector_store %arg6[%c0_8, %c0_9, %c0_10, %c0_11], %20 {strides = array<i32>} : memref<2x8x16x16xf32, #tpu.memory_space<vmem>>, vector<1x1x16x16xf32>,
    %21 = vector.extract_strided_slice %16 {offsets = [0, 16], sizes = [16, 16], strides = [1, 1]} : vector<16x128xf32> to vector<16x16xf32>
    %c0_12 = arith.constant 0 : index
    %c1 = arith.constant 1 : index
    %c0_13 = arith.constant 0 : index
    %c0_14 = arith.constant 0 : index
    %22 = vector.load %arg6[%c0_12, %c1, %c0_13, %c0_14] : memref<2x8x16x16xf32, #tpu.memory_space<vmem>>, vector<1x1x16x16xf32>
    %23 = vector.shape_cast %22 : vector<1x1x16x16xf32> to vector<16x16xf32>
    %24 = vector.shape_cast %21 : vector<16x16xf32> to vector<1x1x16x16xf32>
    tpu.vector_store %arg6[%c0_12, %c1, %c0_13, %c0_14], %24 {strides = array<i32>} : memref<2x8x16x16xf32, #tpu.memory_space<vmem>>, vector<1x1x16x16xf32>,
    %25 = vector.extract_strided_slice %16 {offsets = [0, 32], sizes = [16, 16], strides = [1, 1]} : vector<16x128xf32> to vector<16x16xf32>
    %c0_15 = arith.constant 0 : index
    %c2 = arith.constant 2 : index
    %c0_16 = arith.constant 0 : index
    %c0_17 = arith.constant 0 : index
    %26 = vector.load %arg6[%c0_15, %c2, %c0_16, %c0_17] : memref<2x8x16x16xf32, #tpu.memory_space<vmem>>, vector<1x1x16x16xf32>
    %27 = vector.shape_cast %26 : vector<1x1x16x16xf32> to vector<16x16xf32>
    %28 = vector.shape_cast %25 : vector<16x16xf32> to vector<1x1x16x16xf32>
    tpu.vector_store %arg6[%c0_15, %c2, %c0_16, %c0_17], %28 {strides = array<i32>} : memref<2x8x16x16xf32, #tpu.memory_space<vmem>>, vector<1x1x16x16xf32>,
    %29 = vector.extract_strided_slice %16 {offsets = [0, 48], sizes = [16, 16], strides = [1, 1]} : vector<16x128xf32> to vector<16x16xf32>
    %c0_18 = arith.constant 0 : index
    %c3 = arith.constant 3 : index
    %c0_19 = arith.constant 0 : index
    %c0_20 = arith.constant 0 : index
    %30 = vector.load %arg6[%c0_18, %c3, %c0_19, %c0_20] : memref<2x8x16x16xf32, #tpu.memory_space<vmem>>, vector<1x1x16x16xf32>
    %31 = vector.shape_cast %30 : vector<1x1x16x16xf32> to vector<16x16xf32>
    %32 = vector.shape_cast %29 : vector<16x16xf32> to vector<1x1x16x16xf32>
    tpu.vector_store %arg6[%c0_18, %c3, %c0_19, %c0_20], %32 {strides = array<i32>} : memref<2x8x16x16xf32, #tpu.memory_space<vmem>>, vector<1x1x16x16xf32>,
    %33 = vector.extract_strided_slice %16 {offsets = [0, 64], sizes = [16, 16], strides = [1, 1]} : vector<16x128xf32> to vector<16x16xf32>
    %c0_21 = arith.constant 0 : index
    %c4 = arith.constant 4 : index
    %c0_22 = arith.constant 0 : index
    %c0_23 = arith.constant 0 : index
    %34 = vector.load %arg6[%c0_21, %c4, %c0_22, %c0_23] : memref<2x8x16x16xf32, #tpu.memory_space<vmem>>, vector<1x1x16x16xf32>
    %35 = vector.shape_cast %34 : vector<1x1x16x16xf32> to vector<16x16xf32>
    %36 = vector.shape_cast %33 : vector<16x16xf32> to vector<1x1x16x16xf32>
    tpu.vector_store %arg6[%c0_21, %c4, %c0_22, %c0_23], %36 {strides = array<i32>} : memref<2x8x16x16xf32, #tpu.memory_space<vmem>>, vector<1x1x16x16xf32>,
    %37 = vector.extract_strided_slice %16 {offsets = [0, 80], sizes = [16, 16], strides = [1, 1]} : vector<16x128xf32> to vector<16x16xf32>
    %c0_24 = arith.constant 0 : index
    %c5 = arith.constant 5 : index
    %c0_25 = arith.constant 0 : index
    %c0_26 = arith.constant 0 : index
    %38 = vector.load %arg6[%c0_24, %c5, %c0_25, %c0_26] : memref<2x8x16x16xf32, #tpu.memory_space<vmem>>, vector<1x1x16x16xf32>
    %39 = vector.shape_cast %38 : vector<1x1x16x16xf32> to vector<16x16xf32>
    %40 = vector.shape_cast %37 : vector<16x16xf32> to vector<1x1x16x16xf32>
    tpu.vector_store %arg6[%c0_24, %c5, %c0_25, %c0_26], %40 {strides = array<i32>} : memref<2x8x16x16xf32, #tpu.memory_space<vmem>>, vector<1x1x16x16xf32>,
    %41 = vector.extract_strided_slice %16 {offsets = [0, 96], sizes = [16, 16], strides = [1, 1]} : vector<16x128xf32> to vector<16x16xf32>
    %c0_27 = arith.constant 0 : index
    %c6 = arith.constant 6 : index
    %c0_28 = arith.constant 0 : index
    %c0_29 = arith.constant 0 : index
    %42 = vector.load %arg6[%c0_27, %c6, %c0_28, %c0_29] : memref<2x8x16x16xf32, #tpu.memory_space<vmem>>, vector<1x1x16x16xf32>
    %43 = vector.shape_cast %42 : vector<1x1x16x16xf32> to vector<16x16xf32>
    %44 = vector.shape_cast %41 : vector<16x16xf32> to vector<1x1x16x16xf32>
    tpu.vector_store %arg6[%c0_27, %c6, %c0_28, %c0_29], %44 {strides = array<i32>} : memref<2x8x16x16xf32, #tpu.memory_space<vmem>>, vector<1x1x16x16xf32>,
    %45 = vector.extract_strided_slice %16 {offsets = [0, 112], sizes = [16, 16], strides = [1, 1]} : vector<16x128xf32> to vector<16x16xf32>
    %c0_30 = arith.constant 0 : index
    %c7 = arith.constant 7 : index
    %c0_31 = arith.constant 0 : index
    %c0_32 = arith.constant 0 : index
    %46 = vector.load %arg6[%c0_30, %c7, %c0_31, %c0_32] : memref<2x8x16x16xf32, #tpu.memory_space<vmem>>, vector<1x1x16x16xf32>
    %47 = vector.shape_cast %46 : vector<1x1x16x16xf32> to vector<16x16xf32>
    %48 = vector.shape_cast %45 : vector<16x16xf32> to vector<1x1x16x16xf32>
    tpu.vector_store %arg6[%c0_30, %c7, %c0_31, %c0_32], %48 {strides = array<i32>} : memref<2x8x16x16xf32, #tpu.memory_space<vmem>>, vector<1x1x16x16xf32>,
    %c1_33 = arith.constant 1 : index
    %c0_34 = arith.constant 0 : index
    %c0_35 = arith.constant 0 : index
    %49 = vector.load %arg0[%c1_33, %c0_34, %c0_35] : memref<2x18x72xf32, #tpu.memory_space<vmem>>, vector<1x18x72xf32>
    %50 = vector.shape_cast %49 : vector<1x18x72xf32> to vector<18x72xf32>
    %51 = vector.extract_strided_slice %50 {offsets = [0, 0], sizes = [16, 72], strides = [1, 1]} : vector<18x72xf32> to vector<16x72xf32>
    %52 = vector.extract_strided_slice %0 {offsets = [0, 0], sizes = [72, 128], strides = [1, 1]} : vector<216x128xf32> to vector<72x128xf32>
    %cst_36 = arith.constant dense<0.000000e+00> : vector<16x128xf32>
    %53 = tpu.matmul %51, %52, %cst_36 {dimension_numbers = #tpu.dot_dimension_numbers<[1], [0], [0], [1], [0, 0, 1, 1], [], []>} : vector<16x72xf32>, vector<72x128xf32>, vector<16x128xf32> -> vector<16x128xf32>
    %54 = vector.extract_strided_slice %50 {offsets = [1, 0], sizes = [16, 72], strides = [1, 1]} : vector<18x72xf32> to vector<16x72xf32>
    %55 = vector.extract_strided_slice %0 {offsets = [72, 0], sizes = [72, 128], strides = [1, 1]} : vector<216x128xf32> to vector<72x128xf32>
    %cst_37 = arith.constant dense<0.000000e+00> : vector<16x128xf32>
    %56 = tpu.matmul %54, %55, %cst_37 {dimension_numbers = #tpu.dot_dimension_numbers<[1], [0], [0], [1], [0, 0, 1, 1], [], []>} : vector<16x72xf32>, vector<72x128xf32>, vector<16x128xf32> -> vector<16x128xf32>
    %57 = arith.addf %53, %56 : vector<16x128xf32>
    %58 = vector.extract_strided_slice %50 {offsets = [2, 0], sizes = [16, 72], strides = [1, 1]} : vector<18x72xf32> to vector<16x72xf32>
    %59 = vector.extract_strided_slice %0 {offsets = [144, 0], sizes = [72, 128], strides = [1, 1]} : vector<216x128xf32> to vector<72x128xf32>
    %cst_38 = arith.constant dense<0.000000e+00> : vector<16x128xf32>
    %60 = tpu.matmul %58, %59, %cst_38 {dimension_numbers = #tpu.dot_dimension_numbers<[1], [0], [0], [1], [0, 0, 1, 1], [], []>} : vector<16x72xf32>, vector<72x128xf32>, vector<16x128xf32> -> vector<16x128xf32>
    %61 = arith.addf %57, %60 : vector<16x128xf32>
    %62 = vector.broadcast %1 : vector<1x128xf32> to vector<16x128xf32>
    %63 = arith.addf %61, %62 : vector<16x128xf32>
    %64 = vector.extract_strided_slice %63 {offsets = [0, 0], sizes = [16, 16], strides = [1, 1]} : vector<16x128xf32> to vector<16x16xf32>
    %c1_39 = arith.constant 1 : index
    %c0_40 = arith.constant 0 : index
    %c0_41 = arith.constant 0 : index
    %c0_42 = arith.constant 0 : index
    %65 = vector.load %arg6[%c1_39, %c0_40, %c0_41, %c0_42] : memref<2x8x16x16xf32, #tpu.memory_space<vmem>>, vector<1x1x16x16xf32>
    %66 = vector.shape_cast %65 : vector<1x1x16x16xf32> to vector<16x16xf32>
    %67 = vector.shape_cast %64 : vector<16x16xf32> to vector<1x1x16x16xf32>
    tpu.vector_store %arg6[%c1_39, %c0_40, %c0_41, %c0_42], %67 {strides = array<i32>} : memref<2x8x16x16xf32, #tpu.memory_space<vmem>>, vector<1x1x16x16xf32>,
    %68 = vector.extract_strided_slice %63 {offsets = [0, 16], sizes = [16, 16], strides = [1, 1]} : vector<16x128xf32> to vector<16x16xf32>
    %c1_43 = arith.constant 1 : index
    %c1_44 = arith.constant 1 : index
    %c0_45 = arith.constant 0 : index
    %c0_46 = arith.constant 0 : index
    %69 = vector.load %arg6[%c1_43, %c1_44, %c0_45, %c0_46] : memref<2x8x16x16xf32, #tpu.memory_space<vmem>>, vector<1x1x16x16xf32>
    %70 = vector.shape_cast %69 : vector<1x1x16x16xf32> to vector<16x16xf32>
    %71 = vector.shape_cast %68 : vector<16x16xf32> to vector<1x1x16x16xf32>
    tpu.vector_store %arg6[%c1_43, %c1_44, %c0_45, %c0_46], %71 {strides = array<i32>} : memref<2x8x16x16xf32, #tpu.memory_space<vmem>>, vector<1x1x16x16xf32>,
    %72 = vector.extract_strided_slice %63 {offsets = [0, 32], sizes = [16, 16], strides = [1, 1]} : vector<16x128xf32> to vector<16x16xf32>
    %c1_47 = arith.constant 1 : index
    %c2_48 = arith.constant 2 : index
    %c0_49 = arith.constant 0 : index
    %c0_50 = arith.constant 0 : index
    %73 = vector.load %arg6[%c1_47, %c2_48, %c0_49, %c0_50] : memref<2x8x16x16xf32, #tpu.memory_space<vmem>>, vector<1x1x16x16xf32>
    %74 = vector.shape_cast %73 : vector<1x1x16x16xf32> to vector<16x16xf32>
    %75 = vector.shape_cast %72 : vector<16x16xf32> to vector<1x1x16x16xf32>
    tpu.vector_store %arg6[%c1_47, %c2_48, %c0_49, %c0_50], %75 {strides = array<i32>} : memref<2x8x16x16xf32, #tpu.memory_space<vmem>>, vector<1x1x16x16xf32>,
    %76 = vector.extract_strided_slice %63 {offsets = [0, 48], sizes = [16, 16], strides = [1, 1]} : vector<16x128xf32> to vector<16x16xf32>
    %c1_51 = arith.constant 1 : index
    %c3_52 = arith.constant 3 : index
    %c0_53 = arith.constant 0 : index
    %c0_54 = arith.constant 0 : index
    %77 = vector.load %arg6[%c1_51, %c3_52, %c0_53, %c0_54] : memref<2x8x16x16xf32, #tpu.memory_space<vmem>>, vector<1x1x16x16xf32>
    %78 = vector.shape_cast %77 : vector<1x1x16x16xf32> to vector<16x16xf32>
    %79 = vector.shape_cast %76 : vector<16x16xf32> to vector<1x1x16x16xf32>
    tpu.vector_store %arg6[%c1_51, %c3_52, %c0_53, %c0_54], %79 {strides = array<i32>} : memref<2x8x16x16xf32, #tpu.memory_space<vmem>>, vector<1x1x16x16xf32>,
    %80 = vector.extract_strided_slice %63 {offsets = [0, 64], sizes = [16, 16], strides = [1, 1]} : vector<16x128xf32> to vector<16x16xf32>
    %c1_55 = arith.constant 1 : index
    %c4_56 = arith.constant 4 : index
    %c0_57 = arith.constant 0 : index
    %c0_58 = arith.constant 0 : index
    %81 = vector.load %arg6[%c1_55, %c4_56, %c0_57, %c0_58] : memref<2x8x16x16xf32, #tpu.memory_space<vmem>>, vector<1x1x16x16xf32>
    %82 = vector.shape_cast %81 : vector<1x1x16x16xf32> to vector<16x16xf32>
    %83 = vector.shape_cast %80 : vector<16x16xf32> to vector<1x1x16x16xf32>
    tpu.vector_store %arg6[%c1_55, %c4_56, %c0_57, %c0_58], %83 {strides = array<i32>} : memref<2x8x16x16xf32, #tpu.memory_space<vmem>>, vector<1x1x16x16xf32>,
    %84 = vector.extract_strided_slice %63 {offsets = [0, 80], sizes = [16, 16], strides = [1, 1]} : vector<16x128xf32> to vector<16x16xf32>
    %c1_59 = arith.constant 1 : index
    %c5_60 = arith.constant 5 : index
    %c0_61 = arith.constant 0 : index
    %c0_62 = arith.constant 0 : index
    %85 = vector.load %arg6[%c1_59, %c5_60, %c0_61, %c0_62] : memref<2x8x16x16xf32, #tpu.memory_space<vmem>>, vector<1x1x16x16xf32>
    %86 = vector.shape_cast %85 : vector<1x1x16x16xf32> to vector<16x16xf32>
    %87 = vector.shape_cast %84 : vector<16x16xf32> to vector<1x1x16x16xf32>
    tpu.vector_store %arg6[%c1_59, %c5_60, %c0_61, %c0_62], %87 {strides = array<i32>} : memref<2x8x16x16xf32, #tpu.memory_space<vmem>>, vector<1x1x16x16xf32>,
    %88 = vector.extract_strided_slice %63 {offsets = [0, 96], sizes = [16, 16], strides = [1, 1]} : vector<16x128xf32> to vector<16x16xf32>
    %c1_63 = arith.constant 1 : index
    %c6_64 = arith.constant 6 : index
    %c0_65 = arith.constant 0 : index
    %c0_66 = arith.constant 0 : index
    %89 = vector.load %arg6[%c1_63, %c6_64, %c0_65, %c0_66] : memref<2x8x16x16xf32, #tpu.memory_space<vmem>>, vector<1x1x16x16xf32>
    %90 = vector.shape_cast %89 : vector<1x1x16x16xf32> to vector<16x16xf32>
    %91 = vector.shape_cast %88 : vector<16x16xf32> to vector<1x1x16x16xf32>
    tpu.vector_store %arg6[%c1_63, %c6_64, %c0_65, %c0_66], %91 {strides = array<i32>} : memref<2x8x16x16xf32, #tpu.memory_space<vmem>>, vector<1x1x16x16xf32>,
    %92 = vector.extract_strided_slice %63 {offsets = [0, 112], sizes = [16, 16], strides = [1, 1]} : vector<16x128xf32> to vector<16x16xf32>
    %c1_67 = arith.constant 1 : index
    %c7_68 = arith.constant 7 : index
    %c0_69 = arith.constant 0 : index
    %c0_70 = arith.constant 0 : index
    %93 = vector.load %arg6[%c1_67, %c7_68, %c0_69, %c0_70] : memref<2x8x16x16xf32, #tpu.memory_space<vmem>>, vector<1x1x16x16xf32>
    %94 = vector.shape_cast %93 : vector<1x1x16x16xf32> to vector<16x16xf32>
    %95 = vector.shape_cast %92 : vector<16x16xf32> to vector<1x1x16x16xf32>
    tpu.vector_store %arg6[%c1_67, %c7_68, %c0_69, %c0_70], %95 {strides = array<i32>} : memref<2x8x16x16xf32, #tpu.memory_space<vmem>>, vector<1x1x16x16xf32>,
    %96 = tpu.concatenate %16, %63 in 0 : vector<16x128xf32>, vector<16x128xf32> -> vector<32x128xf32>
    %cst_71 = arith.constant 0.000000e+00 : f32
    %97 = vector.broadcast %cst_71 : f32 to vector<32x128xf32>
    %98 = arith.maximumf %96, %97 : vector<32x128xf32>
    %c0_72 = arith.constant 0 : index
    %c0_73 = arith.constant 0 : index
    %99 = vector.load %arg3[%c0_72, %c0_73] : memref<2x32xf32, #tpu.memory_space<vmem>>, vector<2x32xf32>
    %cst_74 = arith.constant dense<0.000000e+00> : vector<2x128xf32>
    %100 = tpu.matmul %99, %98, %cst_74 {dimension_numbers = #tpu.dot_dimension_numbers<[1], [0], [0], [1], [0, 0, 1, 1], [], []>} : vector<2x32xf32>, vector<32x128xf32>, vector<2x128xf32> -> vector<2x128xf32>
    %c0_75 = arith.constant 0 : index
    %c0_76 = arith.constant 0 : index
    %101 = vector.load %arg4[%c0_75, %c0_76] : memref<128x18xf32, #tpu.memory_space<vmem>>, vector<128x18xf32>
    %cst_77 = arith.constant dense<0.000000e+00> : vector<2x18xf32>
    %102 = tpu.matmul %100, %101, %cst_77 {dimension_numbers = #tpu.dot_dimension_numbers<[1], [0], [0], [1], [0, 0, 1, 1], [], []>} : vector<2x128xf32>, vector<128x18xf32>, vector<2x18xf32> -> vector<2x18xf32>
    %c0_78 = arith.constant 0 : index
    %c0_79 = arith.constant 0 : index
    %103 = vector.load %arg5[%c0_78, %c0_79] : memref<1x18xf32, #tpu.memory_space<vmem>>, vector<1x18xf32>
    %104 = vector.broadcast %103 : vector<1x18xf32> to vector<2x18xf32>
    %105 = arith.addf %102, %104 : vector<2x18xf32>
    %c0_80 = arith.constant 0 : index
    %c0_81 = arith.constant 0 : index
    %106 = vector.load %arg7[%c0_80, %c0_81] : memref<2x18xf32, #tpu.memory_space<vmem>>, vector<2x18xf32>
    tpu.vector_store %arg7[%c0_80, %c0_81], %105 {strides = array<i32>} : memref<2x18xf32, #tpu.memory_space<vmem>>, vector<2x18xf32>,
    return
  }
}

</mosaic_0001>

<bundles_post_ra>
// kernel: forward_hook_model.1
= control target key start
LH: loop header
LB: loop body
LE: loop exit
PB: predicated region body
PF: predicated region fallthrough
CT: control target
= control target key end

     0   :  { %vm60_vm0 = vcmask 1046528   ;;  %vm66_vm1 = vcmask 588800   ;;  %s1620_s0 = inlined_call_operand.vmem [shape: f32[2,18,72], index: 0, kind: input, shape index: {}]   ;;  %s1621_s1 = inlined_call_operand.vmem [shape: f32[216,128], index: 1, kind: input, shape index: {}]   ;;  %s1622_s2 = inlined_call_operand.vmem [shape: f32[1,128], index: 2, kind: input, shape index: {}]   ;;  %s1623_s3 = inlined_call_operand.vmem [shape: f32[2,32], index: 3, kind: input, shape index: {}]   ;;  %s1624_s4 = inlined_call_operand.vmem [shape: f32[128,18], index: 4, kind: input, shape index: {}]   ;;  %s1625_s5 = inlined_call_operand.vmem [shape: f32[1,18], index: 5, kind: input, shape index: {}]   ;;  %s1626_s6 = inlined_call_operand.hbm [shape: f32[2,8,16,16], index: 6, kind: output, shape index: {0}]   ;;  %s1627_s7 = inlined_call_operand.vmem [shape: f32[2,18], index: 7, kind: output, shape index: {1}]  }
   0x1   :  { %v43_v0 = vld [vmem:[%s1621_s1 + $0x88] sm:$0xff]  ;;  %v42_v1 = vld [vmem:[%s1621_s1 + $0x80] sm:$0xff]  ;;  %v41_v2 = vld [vmem:[%s1621_s1 + $0x78] sm:$0xff] }
   0x2   :  { %1014 = vmatprep.subr.mxu0 %v43_v0  ;;  %1077 = vmatprep.subr.mxu1 %v43_v0  ;;  %v1284_v3 = vld [vmem:[%s1620_s0] sm:$0xff]  ;;  %v1289_v4 = vld [vmem:[%s1620_s0 + $0x8] sm:$0xff]  ;;  %v40_v5 = vld [vmem:[%s1621_s1 + $0x70] sm:$0xff] }
   0x3   :  { %1015 = vmatpush3.msra.mxu0 %v43_v0  ;;  %1078 = vmatpush3.msra.mxu1 %v43_v0  ;;  %v61_v6 = vrot.slane %v1284_v3, 1  ;;  %v62_v7 = vrot.slane %v1289_v4, 1  ;;  %v39_v8 = vld [vmem:[%s1621_s1 + $0x68] sm:$0xff]  ;;  %v38_v10 = vld [vmem:[%s1621_s1 + $0x60] sm:$0xff]  ;;  %v1307_v11 = vld [vmem:[%s1620_s0 + $0x10] sm:$0x3] }
   0x4   :  { %1016 = vmatprep.subr.mxu0 %v42_v1  ;;  %1079 = vmatprep.subr.mxu1 %v42_v1  ;;  %v37_v12 = vld [vmem:[%s1621_s1 + $0x58] sm:$0xff]  ;;  %v36_v13 = vld [vmem:[%s1621_s1 + $0x50] sm:$0xff]  ;;  %v64_v14 = vrot.slane %v1307_v11, 1  ;;  %v1324_v16 = vld [vmem:[%s1620_s0 + $0x20] sm:$0xff] }
   0x5   :  { %1017 = vmatpush3.msra.mxu0 %v42_v1  ;;  %1080 = vmatpush3.msra.mxu1 %v42_v1  ;;  %v63_v9 = vsel %vm60_vm0, %v61_v6, %v62_v7  ;;  %v1319_v15 = vld [vmem:[%s1620_s0 + $0x18] sm:$0xff] }
   0x6   :  { %1018 = vmatprep.subr.mxu0 %v41_v2  ;;  %1081 = vmatprep.subr.mxu1 %v41_v2 }
   0x7   :  { %1019 = vmatpush3.msra.mxu0 %v41_v2  ;;  %1082 = vmatpush3.msra.mxu1 %v41_v2 }
   0x8   :  { %1020 = vmatprep.subr.mxu0 %v40_v5  ;;  %1032 = vmatprep.mubr.msk.f32.mxu0 %vm66_vm1, %v63_v9 }
   0x9   :  { %1021 = vmatpush3.msra.mxu0 %v40_v5  ;;  %1083 = vmatprep.subr.mxu1 %v40_v5 }
   0xa   :  { %1022 = vmatprep.subr.mxu0 %v39_v8  ;;  %1084 = vmatpush3.msra.mxu1 %v40_v5 }
   0xb   :  { %1023 = vmatpush3.msra.mxu0 %v39_v8  ;;  %1085 = vmatprep.subr.mxu1 %v39_v8 }
   0xc   :  { %1024 = vmatprep.subr.mxu0 %v38_v10  ;;  %1086 = vmatpush3.msra.mxu1 %v39_v8 }
   0xd   :  { %1025 = vmatpush3.msra.mxu0 %v38_v10  ;;  %1087 = vmatprep.subr.mxu1 %v38_v10 }
   0xe   :  { %13 = vsyncpa [#allocation3], 0  ;;  %1026 = vmatprep.subr.mxu0 %v37_v12  ;;  %1088 = vmatpush3.msra.mxu1 %v38_v10  ;;  %v35_v17 = vld [vmem:[%s1621_s1 + $0x48] sm:$0xff]  ;;  %v395_v19 = vrot.slane %v1319_v15, 1  ;;  %v396_v20 = vrot.slane %v1324_v16, 1  ;;  %v65_v21 = vsel %vm60_vm0, %v62_v7, %v64_v14  ;;  %v1340_v22 = vld [vmem:[%s1621_s1 + $0x40] sm:$0xff] }
   0xf   :  { %1027 = vmatpush3.msra.mxu0 %v37_v12  ;;  %1089 = vmatprep.subr.mxu1 %v37_v12  ;;  %v1332_v18 = vld [vmem:[%s1620_s0 + $0x28] sm:$0x3]  ;;  %v1346_v24 = vld [vmem:[%s1621_s1 + $0x38] sm:$0xff]  ;;  %v1355_v26 = vld [vmem:[%s1621_s1 + $0x30] sm:$0xff]  ;;  %v226_v38 = vrot.slane %v1284_v3, 2  ;;  %v227_v39 = vrot.slane %v1289_v4, 2 }
  0x10   :  { %1028 = vmatprep.subr.mxu0 %v36_v13  ;;  %1090 = vmatpush3.msra.mxu1 %v37_v12  ;;  %v398_v23 = vrot.slane %v1332_v18, 1  ;;  %v397_v25 = vsel %vm60_vm0, %v395_v19, %v396_v20  ;;  %v1365_v28 = vld [vmem:[%s1621_s1 + $0x28] sm:$0xff]  ;;  %v52_v29 = vld [vmem:[%s1621_s1 + $0xd0] sm:$0xff]  ;;  %v1376_v30 = vld [vmem:[%s1621_s1 + $0x20] sm:$0xff]  ;;  %vm225_vm2 = vcmask 1045504   ;;  %v558_v44 = vrot.slane %v1319_v15, 2 }
  0x11   :  { %1029 = vmatpush3.msra.mxu0 %v36_v13  ;;  %1091 = vmatprep.subr.mxu1 %v36_v13  ;;  %v51_v31 = vld [vmem:[%s1621_s1 + $0xc8] sm:$0xff]  ;;  %v1387_v32 = vld [vmem:[%s1621_s1 + $0x18] sm:$0xff]  ;;  %v50_v33 = vld [vmem:[%s1621_s1 + $0xc0] sm:$0xff]  ;;  %v228_v43 = vsel %vm225_vm2, %v226_v38, %v227_v39  ;;  %v559_v45 = vrot.slane %v1324_v16, 2  ;;  %v561_v46 = vrot.slane %v1332_v18, 2  ;;  %v229_v51 = vrot.slane %v1307_v11, 2 }
  0x12   :  { %1030 = vmatprep.subr.mxu0 %v35_v17  ;;  %1092 = vmatpush3.msra.mxu1 %v36_v13  ;;  %v399_v27 = vsel %vm60_vm0, %v396_v20, %v398_v23  ;;  %v1397_v34 = vld [vmem:[%s1621_s1 + $0x10] sm:$0xff]  ;;  %v49_v35 = vld [vmem:[%s1621_s1 + $0xb8] sm:$0xff]  ;;  %v1407_v36 = vld [vmem:[%s1621_s1 + $0x8] sm:$0xff]  ;;  %v1220_v53 = vmov 0.0   ;;  %vm1221_vm3 = vmmov 0   ;;  %vm320_vm4 = vcmask 130048  }
  0x13   :  { %1031 = vmatpush3.msra.mxu0 %v35_v17  ;;  %1093 = vmatprep.subr.mxu1 %v35_v17  ;;  %v48_v37 = vld [vmem:[%s1621_s1 + $0xb0] sm:$0xff]  ;;  %v1419_v40 = vld [vmem:[%s1621_s1] sm:$0xff]  ;;  %v47_v41 = vld [vmem:[%s1621_s1 + $0xa8] sm:$0xff]  ;;  %v560_v49 = vsel %vm225_vm2, %v558_v44, %v559_v45  ;;  %v562_v50 = vsel %vm225_vm2, %v559_v45, %v561_v46  ;;  %v230_v52 = vsel %vm225_vm2, %v227_v39, %v229_v51  ;;  %s1222_s20 = smov 96   ;;  %s1223_s21 = smov 112   ;;  %vm719_vm5 = vcmask 261120  }
  0x14   :  { %1033 = vmatmul.mubr.msk.f32.vlgmr.msra.gmra.mxu0 %vm66_vm1, %v65_v21  ;;  %1035 = vmatprep.subr.mxu0 %v1340_v22  ;;  %v46_v42 = vld [vmem:[%s1621_s1 + $0xa0] sm:$0xff]  ;;  %v45_v47 = vld [vmem:[%s1621_s1 + $0x98] sm:$0xff]  ;;  %v44_v48 = vld [vmem:[%s1621_s1 + $0x90] sm:$0xff]  ;;  %s1224_s22 = smov 80   ;;  %s1226_s23 = smov 48  }
  0x15   :  { %1036 = vmatpush3.msra.mxu0 %v1340_v22  ;;  %1053 = vmatprep.mubr.msk.f32.mxu0 %vm66_vm1, %v1284_v3  ;;  %v914_v59 = vld [vmem:[%s1622_s2] ss:$0 sm:$0xff]  ;;  %s1225_s2 = smov 64   ;;  %s1227_s24 = smov 32   ;;  %v808_v20 = vld [vmem:[%s1624_s4 + $0x78] sm:$0xff]  ;;  %v807_v21 = vld [vmem:[%s1624_s4 + $0x70] sm:$0xff] }
  0x16   :  { %1037 = vmatprep.subr.mxu0 %v1346_v24  ;;  %1094 = vmatpush3.msra.mxu1 %v35_v17  ;;  %s1228_s25 = smov 16   ;;  %v718_v19 = vld [vmem:[%s1623_s3] sm:$0x3] }
  0x17   :  { %1038 = vmatpush3.msra.mxu0 %v1346_v24  ;;  %1095 = vmatprep.mubr.msk.f32.mxu1 %vm66_vm1, %v397_v25  ;;  %v805_v23 = vld [vmem:[%s1624_s4 + $0x60] sm:$0xff]  ;;  %v803_v25 = vld [vmem:[%s1624_s4 + $0x50] sm:$0xff] }
  0x18   :  { %1039 = vmatprep.subr.mxu0 %v1355_v26  ;;  %1119 = vmatprep.subr.mxu1 %v52_v29 }
  0x19   :  { %1040 = vmatpush3.msra.mxu0 %v1355_v26  ;;  %1096 = vmatmul.mubr.msk.f32.vlgmr.msra.gmra.mxu1 %vm66_vm1, %v399_v27  ;;  %v801_v27 = vld [vmem:[%s1624_s4 + $0x40] sm:$0xff] }
  0x1a   :  { %1041 = vmatprep.subr.mxu0 %v1365_v28  ;;  %1120 = vmatpush3.msra.mxu1 %v52_v29 }
  0x1b   :  { %1042 = vmatpush3.msra.mxu0 %v1365_v28  ;;  %1121 = vmatprep.subr.mxu1 %v51_v31 }
  0x1c   :  { %1043 = vmatprep.subr.mxu0 %v1376_v30  ;;  %1122 = vmatpush3.msra.mxu1 %v51_v31 }
  0x1d   :  { %1044 = vmatpush3.msra.mxu0 %v1376_v30  ;;  %1123 = vmatprep.subr.mxu1 %v50_v33 }
  0x1e   :  { %1045 = vmatprep.subr.mxu0 %v1387_v32  ;;  %1124 = vmatpush3.msra.mxu1 %v50_v33 }
  0x1f   :  { %1046 = vmatpush3.msra.mxu0 %v1387_v32  ;;  %1125 = vmatprep.subr.mxu1 %v49_v35 }
  0x20   :  { %1047 = vmatprep.subr.mxu0 %v1397_v34  ;;  %1126 = vmatpush3.msra.mxu1 %v49_v35 }
  0x21   :  { %1048 = vmatpush3.msra.mxu0 %v1397_v34  ;;  %1127 = vmatprep.subr.mxu1 %v48_v37 }
  0x22   :  { %1049 = vmatprep.subr.mxu0 %v1407_v36  ;;  %1128 = vmatpush3.msra.mxu1 %v48_v37 }
  0x23   :  { %1050 = vmatpush3.msra.mxu0 %v1407_v36  ;;  %1129 = vmatprep.subr.mxu1 %v47_v41 }
  0x24   :  { %1051 = vmatprep.subr.mxu0 %v1419_v40  ;;  %1130 = vmatpush3.msra.mxu1 %v47_v41 }
  0x25   :  { %1052 = vmatpush3.msra.mxu0 %v1419_v40  ;;  %1131 = vmatprep.subr.mxu1 %v46_v42 }
  0x26   :  { %1054 = vmatmul.mubr.msk.f32.vlgmr.msra.gmra.mxu0 %vm66_vm1, %v1289_v4  ;;  %1056 = vmatprep.subr.mxu0 %v52_v29 }
  0x27   :  { %1057 = vmatpush3.msra.mxu0 %v52_v29  ;;  %1074 = vmatprep.mubr.msk.f32.mxu0 %vm66_vm1, %v228_v43  ;;  %v799_v29 = vld [vmem:[%s1624_s4 + $0x30] sm:$0xff] }
  0x28   :  { %1058 = vmatprep.subr.mxu0 %v51_v31  ;;  %1132 = vmatpush3.msra.mxu1 %v46_v42 }
  0x29   :  { %1059 = vmatpush3.msra.mxu0 %v51_v31  ;;  %1133 = vmatprep.subr.mxu1 %v45_v47  ;;  %v797_v31 = vld [vmem:[%s1624_s4 + $0x20] sm:$0xff] }
  0x2a   :  { %1060 = vmatprep.subr.mxu0 %v50_v33  ;;  %1134 = vmatpush3.msra.mxu1 %v45_v47 }
  0x2b   :  { %1061 = vmatpush3.msra.mxu0 %v50_v33  ;;  %1135 = vmatprep.subr.mxu1 %v44_v48  ;;  %v795_v33 = vld [vmem:[%s1624_s4 + $0x10] sm:$0xff] }
  0x2c   :  { %1062 = vmatprep.subr.mxu0 %v49_v35  ;;  %1136 = vmatpush3.msra.mxu1 %v44_v48 }
  0x2d   :  { %1063 = vmatpush3.msra.mxu0 %v49_v35  ;;  %1137 = vmatprep.mubr.msk.f32.mxu1 %vm66_vm1, %v560_v49  ;;  %v793_v35 = vld [vmem:[%s1624_s4] sm:$0xff] }
  0x2e   :  { %1064 = vmatprep.subr.mxu0 %v48_v37  ;;  %1138 = vmatmul.mubr.msk.f32.vlgmr.msra.gmra.mxu1 %vm66_vm1, %v562_v50 }
  0x2f   :  { %1065 = vmatpush3.msra.mxu0 %v48_v37  ;;  %1140 = vmatprep.subr.mxu1 %v1220_v53 }
  0x30   :  { %1066 = vmatprep.subr.mxu0 %v47_v41  ;;  %1148 = vmatprep.mubr.msk.f32.mxu1 %vm1221_vm3, %v1220_v53 }
  0x31   :  { %1067 = vmatpush3.msra.mxu0 %v47_v41 }
  0x32   :  { %1068 = vmatprep.subr.mxu0 %v46_v42 }
  0x33   :  { %1069 = vmatpush3.msra.mxu0 %v46_v42 }
  0x34   :  { %1070 = vmatprep.subr.mxu0 %v45_v47 }
  0x35   :  { %1071 = vmatpush3.msra.mxu0 %v45_v47 }
  0x36   :  { %1072 = vmatprep.subr.mxu0 %v44_v48 }
  0x37   :  { %1073 = vmatpush3.msra.mxu0 %v44_v48 }
  0x38   :  { %1075 = vmatmul.mubr.msk.f32.vlgmr.msra.gmra.mxu0 %vm66_vm1, %v230_v52  ;;  %1098 = vmatprep.subr.mxu0 %v1340_v22 }
  0x39   :  { %1099 = vmatpush3.msra.mxu0 %v1340_v22  ;;  %1116 = vmatprep.mubr.msk.f32.mxu0 %vm66_vm1, %v1319_v15  ;;  %v806_v22 = vld [vmem:[%s1624_s4 + $0x68] sm:$0xff] }
  0x3a   :  { %1100 = vmatprep.subr.mxu0 %v1346_v24 }
  0x3b   :  { %1101 = vmatpush3.msra.mxu0 %v1346_v24  ;;  %v804_v24 = vld [vmem:[%s1624_s4 + $0x58] sm:$0xff] }
  0x3c   :  { %1102 = vmatprep.subr.mxu0 %v1355_v26 }
  0x3d   :  { %1103 = vmatpush3.msra.mxu0 %v1355_v26  ;;  %v802_v26 = vld [vmem:[%s1624_s4 + $0x48] sm:$0xff] }
  0x3e   :  { %1104 = vmatprep.subr.mxu0 %v1365_v28 }
  0x3f   :  { %1105 = vmatpush3.msra.mxu0 %v1365_v28  ;;  %v800_v28 = vld [vmem:[%s1624_s4 + $0x38] sm:$0xff] }
  0x40   :  { %1106 = vmatprep.subr.mxu0 %v1376_v30 }
  0x41   :  { %1107 = vmatpush3.msra.mxu0 %v1376_v30  ;;  %v798_v30 = vld [vmem:[%s1624_s4 + $0x28] sm:$0xff] }
  0x42   :  { %1108 = vmatprep.subr.mxu0 %v1387_v32 }
  0x43   :  { %1109 = vmatpush3.msra.mxu0 %v1387_v32  ;;  %v796_v32 = vld [vmem:[%s1624_s4 + $0x18] sm:$0xff] }
  0x44   :  { %1110 = vmatprep.subr.mxu0 %v1397_v34 }
  0x45   :  { %1111 = vmatpush3.msra.mxu0 %v1397_v34  ;;  %v794_v34 = vld [vmem:[%s1624_s4 + $0x8] sm:$0xff]  ;;  %s1229_s4 = smov [#allocation2]  }
  0x46   :  { %1112 = vmatprep.subr.mxu0 %v1407_v36  ;;  %s893_s9 = sshll.u32 %s1229_s4, 4  ;;  %s894_s9 = int_to_ptr.vmem [resolvable:$true] %s893_s9 }
  0x47   :  { %1113 = vmatpush3.msra.mxu0 %v1407_v36  ;;  %s1198_s0 = scalar_lea.vmem %s894_s9, 4096  ;;  %p1203_p1 = scmp.lt.s32.totalorder %s894_s9, %s894_s9 }
  0x48   :  { %1114 = vmatprep.subr.mxu0 %v1419_v40  ;;  %p1199_p0 = scmp.ne.s32.totalorder %s894_s9, %s1198_s0  ;;  %p1204_p2 = scmp.lt.s32.totalorder %s1198_s0, %s1198_s0 }
  0x49   :  { %1115 = vmatpush3.msra.mxu0 %v1419_v40 }
  0x4a   :  { %1117 = vmatmul.mubr.msk.f32.vlgmr.msra.gmra.mxu0 %vm66_vm1, %v1324_v16  ;;  %p1205_p3 = por %p1204_p2, %p1203_p1 }
  0x4c   :  { %p1206_p4 = pnand %p1205_p3, %p1199_p0 }
  0xd4   :  { %v1034_v54 = vpop.f32.mrf.mxu0 }
  0xd6   :  { %v137_v55 = vpop.f32.mrf.mxu0 }
  0xd9   :  { %v1097_v3 = vpop.f32.mrf.mxu1 }
  0xdb   :  { %v470_v4 = vpop.f32.mrf.mxu1 }
  0xe6   :  { %v1055_v56 = vpop.f32.mrf.mxu0 }
  0xe7   :  { %v222_v58 = vadd.f32 %v1055_v56, %v1034_v54 }
  0xe8   :  { %v216_v57 = vpop.f32.mrf.mxu0 }
  0xe9   :  { %v217_v61 = vadd.f32 %v216_v57, %v137_v55 }
  0xee   :  { %v1139_v6 = vpop.f32.mrf.mxu1 }
  0xf0   :  { %v633_v11 = vpop.f32.mrf.mxu1 }
  0xf8   :  { %v1076_v60 = vpop.f32.mrf.mxu0 }
  0xf9   :  { %v311_v62 = vadd.f32 %v1076_v60, %v222_v58 }
  0xfa   :  { %v301_v63 = vpop.f32.mrf.mxu0 }
  0xfb   :  { %v319_v0 = vadd.f32 %v914_v59, %v311_v62  ;;  %v310_v1 = vadd.f32 %v301_v63, %v217_v61 }
  0xfd   :  { %322 = vst.msk [vmem:[#allocation2 + $0x8] sm:$0xff] %vm320_vm4, %v319_v0  ;;  %v318_v2 = vadd.f32 %v914_v59, %v310_v1  ;;  %336 = vrot.lane.b32.xlu1 %v319_v0, %s1222_s20  ;;  %327 = vrot.lane.b32.xlu0 %v319_v0, %s1223_s21  ;;  %v715_v17 = vmax.f32 %v319_v0, 0.0 }
  0xff   :  { %321 = vst.msk [vmem:[#allocation2] sm:$0xff] %vm320_vm4, %v318_v2  ;;  %v714_v18 = vmax.f32 %v318_v2, 0.0 }
 0x101   :  { %345 = vrot.lane.b32.xlu1 %v319_v0, %s1224_s22  ;;  %325 = vrot.lane.b32.xlu0 %v318_v2, %s1223_s21 }
 0x105   :  { %354 = vrot.lane.b32.xlu1 %v319_v0, %s1225_s2  ;;  %343 = vrot.lane.b32.xlu0 %v318_v2, %s1224_s22 }
 0x109   :  { %363 = vrot.lane.b32.xlu1 %v319_v0, %s1226_s23  ;;  %352 = vrot.lane.b32.xlu0 %v318_v2, %s1225_s2 }
 0x10a   :  { %v1118_v5 = vpop.f32.mrf.mxu0 }
 0x10b   :  { %v555_v7 = vadd.f32 %v1118_v5, %v1097_v3 }
 0x10c   :  { %v549_v8 = vpop.f32.mrf.mxu0 }
 0x10d   :  { %v643_v9 = vadd.f32 %v1139_v6, %v555_v7  ;;  %v550_v10 = vadd.f32 %v549_v8, %v470_v4  ;;  %372 = vrot.lane.b32.xlu1 %v319_v0, %s1227_s24  ;;  %361 = vrot.lane.b32.xlu0 %v318_v2, %s1226_s23 }
 0x10f   :  { %v645_v12 = vadd.f32 %v914_v59, %v643_v9  ;;  %v642_v13 = vadd.f32 %v633_v11, %v550_v10 }
 0x111   :  { %648 = vst.msk [vmem:[#allocation2 + $0x88] sm:$0xff] %vm320_vm4, %v645_v12  ;;  %v644_v14 = vadd.f32 %v914_v59, %v642_v13  ;;  %381 = vrot.lane.b32.xlu1 %v319_v0, %s1228_s25  ;;  %370 = vrot.lane.b32.xlu0 %v318_v2, %s1227_s24  ;;  %v717_v15 = vmax.f32 %v645_v12, 0.0 }
 0x113   :  { %647 = vst.msk [vmem:[#allocation2 + $0x80] sm:$0xff] %vm320_vm4, %v644_v14  ;;  %1141 = vmatpush3.msra.mxu1 %v717_v15  ;;  %v716_v16 = vmax.f32 %v644_v14, 0.0 }
 0x114   :  { %1142 = vmatprep.subr.mxu1 %v1220_v53 }
 0x115   :  { %1143 = vmatpush3.msra.mxu1 %v716_v16  ;;  %334 = vrot.lane.b32.xlu1 %v318_v2, %s1222_s20 }
 0x116   :  { %379 = vrot.lane.b32.xlu0 %v318_v2, %s1228_s25  ;;  %1144 = vmatprep.subr.mxu1 %v1220_v53 }
 0x117   :  { %1145 = vmatpush3.msra.mxu1 %v715_v17 }
 0x118   :  { %1146 = vmatprep.subr.mxu1 %v1220_v53 }
 0x119   :  { %653 = vrot.lane.b32.xlu1 %v645_v12, %s1223_s21  ;;  %1147 = vmatpush3.msra.mxu1 %v714_v18 }
 0x11a   :  { %651 = vrot.lane.b32.xlu0 %v644_v14, %s1223_s21  ;;  %1149 = vmatmul.mubr.msk.f32.vlgmr.msra.gmra.mxu1 %vm719_vm5, %v718_v19 }
 0x11b   :  { %1151 = vmatprep.subr.mxu1 %v1220_v53  ;;  %1183 = vmatprep.mubr.msk.f32.mxu1 %vm1221_vm3, %v1220_v53 }
 0x11c   :  { %1152 = vmatpush3.msra.mxu1 %v808_v20 }
 0x11d   :  { %662 = vrot.lane.b32.xlu1 %v645_v12, %s1222_s20  ;;  %1153 = vmatprep.subr.mxu1 %v1220_v53 }
 0x11e   :  { %660 = vrot.lane.b32.xlu0 %v644_v14, %s1222_s20  ;;  %1154 = vmatpush3.msra.mxu1 %v807_v21 }
 0x11f   :  { %1155 = vmatprep.subr.mxu1 %v1220_v53 }
 0x120   :  { %1156 = vmatpush3.msra.mxu1 %v806_v22 }
 0x121   :  { %671 = vrot.lane.b32.xlu1 %v645_v12, %s1224_s22  ;;  %1157 = vmatprep.subr.mxu1 %v1220_v53 }
 0x122   :  { %669 = vrot.lane.b32.xlu0 %v644_v14, %s1224_s22  ;;  %1158 = vmatpush3.msra.mxu1 %v805_v23 }
 0x123   :  { %1159 = vmatprep.subr.mxu1 %v1220_v53 }
 0x124   :  { %1160 = vmatpush3.msra.mxu1 %v804_v24 }
 0x125   :  { %680 = vrot.lane.b32.xlu1 %v645_v12, %s1225_s2  ;;  %1161 = vmatprep.subr.mxu1 %v1220_v53 }
 0x126   :  { %678 = vrot.lane.b32.xlu0 %v644_v14, %s1225_s2  ;;  %1162 = vmatpush3.msra.mxu1 %v803_v25 }
 0x127   :  { %1163 = vmatprep.subr.mxu1 %v1220_v53 }
 0x128   :  { %1164 = vmatpush3.msra.mxu1 %v802_v26 }
 0x129   :  { %689 = vrot.lane.b32.xlu1 %v645_v12, %s1226_s23  ;;  %1165 = vmatprep.subr.mxu1 %v1220_v53 }
 0x12a   :  { %687 = vrot.lane.b32.xlu0 %v644_v14, %s1226_s23  ;;  %1166 = vmatpush3.msra.mxu1 %v801_v27 }
 0x12b   :  { %1167 = vmatprep.subr.mxu1 %v1220_v53 }
 0x12c   :  { %1168 = vmatpush3.msra.mxu1 %v800_v28 }
 0x12d   :  { %698 = vrot.lane.b32.xlu1 %v645_v12, %s1227_s24  ;;  %1169 = vmatprep.subr.mxu1 %v1220_v53 }
 0x12e   :  { %696 = vrot.lane.b32.xlu0 %v644_v14, %s1227_s24  ;;  %1170 = vmatpush3.msra.mxu1 %v799_v29 }
 0x12f   :  { %1171 = vmatprep.subr.mxu1 %v1220_v53 }
 0x130   :  { %1172 = vmatpush3.msra.mxu1 %v798_v30 }
 0x131   :  { %707 = vrot.lane.b32.xlu1 %v645_v12, %s1228_s25  ;;  %1173 = vmatprep.subr.mxu1 %v1220_v53 }
 0x132   :  { %705 = vrot.lane.b32.xlu0 %v644_v14, %s1228_s25  ;;  %1174 = vmatpush3.msra.mxu1 %v797_v31 }
 0x133   :  { %1175 = vmatprep.subr.mxu1 %v1220_v53 }
 0x134   :  { %1176 = vmatpush3.msra.mxu1 %v796_v32 }
 0x135   :  { %1177 = vmatprep.subr.mxu1 %v1220_v53 }
 0x136   :  { %1178 = vmatpush3.msra.mxu1 %v795_v33 }
 0x137   :  { %1179 = vmatprep.subr.mxu1 %v1220_v53 }
 0x138   :  { %1180 = vmatpush3.msra.mxu1 %v794_v34 }
 0x139   :  { %1181 = vmatprep.subr.mxu1 %v1220_v53 }
 0x13a   :  { %1182 = vmatpush3.msra.mxu1 %v793_v35 }
 0x16f   :  { %v337_v36 = vpop.permute.xlu1 %336  ;;  %v328_v37 = vpop.permute.xlu0 %327 }
 0x170   :  { %342 = vst.msk [vmem:[#allocation2 + $0x28] sm:$0xff] %vm320_vm4, %v337_v36  ;;  %333 = vst.msk [vmem:[#allocation2 + $0x18] sm:$0xff] %vm320_vm4, %v328_v37 }
 0x173   :  { %v346_v38 = vpop.permute.xlu1 %345  ;;  %v326_v39 = vpop.permute.xlu0 %325 }
 0x174   :  { %351 = vst.msk [vmem:[#allocation2 + $0x38] sm:$0xff] %vm320_vm4, %v346_v38  ;;  %332 = vst.msk [vmem:[#allocation2 + $0x10] sm:$0xff] %vm320_vm4, %v326_v39 }
 0x177   :  { %v355_v40 = vpop.permute.xlu1 %354  ;;  %v344_v41 = vpop.permute.xlu0 %343 }
 0x178   :  { %360 = vst.msk [vmem:[#allocation2 + $0x48] sm:$0xff] %vm320_vm4, %v355_v40  ;;  %350 = vst.msk [vmem:[#allocation2 + $0x30] sm:$0xff] %vm320_vm4, %v344_v41 }
 0x17b   :  { %v364_v42 = vpop.permute.xlu1 %363  ;;  %v353_v43 = vpop.permute.xlu0 %352 }
 0x17c   :  { %369 = vst.msk [vmem:[#allocation2 + $0x58] sm:$0xff] %vm320_vm4, %v364_v42  ;;  %359 = vst.msk [vmem:[#allocation2 + $0x40] sm:$0xff] %vm320_vm4, %v353_v43 }
 0x17f   :  { %v373_v44 = vpop.permute.xlu1 %372  ;;  %v362_v45 = vpop.permute.xlu0 %361 }
 0x180   :  { %378 = vst.msk [vmem:[#allocation2 + $0x68] sm:$0xff] %vm320_vm4, %v373_v44  ;;  %368 = vst.msk [vmem:[#allocation2 + $0x50] sm:$0xff] %vm320_vm4, %v362_v45 }
 0x183   :  { %v382_v46 = vpop.permute.xlu1 %381  ;;  %v371_v47 = vpop.permute.xlu0 %370 }
 0x184   :  { %387 = vst.msk [vmem:[#allocation2 + $0x78] sm:$0xff] %vm320_vm4, %v382_v46  ;;  %377 = vst.msk [vmem:[#allocation2 + $0x60] sm:$0xff] %vm320_vm4, %v371_v47 }
 0x187   :  { %v335_v48 = vpop.permute.xlu1 %334 }
 0x188   :  { %341 = vst.msk [vmem:[#allocation2 + $0x20] sm:$0xff] %vm320_vm4, %v335_v48  ;;  %v380_v49 = vpop.permute.xlu0 %379 }
 0x189   :  { %386 = vst.msk [vmem:[#allocation2 + $0x70] sm:$0xff] %vm320_vm4, %v380_v49 }
 0x18b   :  { %v654_v50 = vpop.permute.xlu1 %653 }
 0x18c   :  { %659 = vst.msk [vmem:[#allocation2 + $0x98] sm:$0xff] %vm320_vm4, %v654_v50  ;;  %v652_v51 = vpop.permute.xlu0 %651 }
 0x18d   :  { %658 = vst.msk [vmem:[#allocation2 + $0x90] sm:$0xff] %vm320_vm4, %v652_v51 }
 0x18f   :  { %v663_v52 = vpop.permute.xlu1 %662 }
 0x190   :  { %668 = vst.msk [vmem:[#allocation2 + $0xa8] sm:$0xff] %vm320_vm4, %v663_v52  ;;  %v661_v53 = vpop.permute.xlu0 %660 }
 0x191   :  { %667 = vst.msk [vmem:[#allocation2 + $0xa0] sm:$0xff] %vm320_vm4, %v661_v53 }
 0x193   :  { %v672_v54 = vpop.permute.xlu1 %671 }
 0x194   :  { %677 = vst.msk [vmem:[#allocation2 + $0xb8] sm:$0xff] %vm320_vm4, %v672_v54  ;;  %v670_v55 = vpop.permute.xlu0 %669 }
 0x195   :  { %676 = vst.msk [vmem:[#allocation2 + $0xb0] sm:$0xff] %vm320_vm4, %v670_v55 }
 0x197   :  { %v681_v56 = vpop.permute.xlu1 %680 }
 0x198   :  { %686 = vst.msk [vmem:[#allocation2 + $0xc8] sm:$0xff] %vm320_vm4, %v681_v56  ;;  %v679_v57 = vpop.permute.xlu0 %678 }
 0x199   :  { %685 = vst.msk [vmem:[#allocation2 + $0xc0] sm:$0xff] %vm320_vm4, %v679_v57 }
 0x19b   :  { %v690_v58 = vpop.permute.xlu1 %689 }
 0x19c   :  { %695 = vst.msk [vmem:[#allocation2 + $0xd8] sm:$0xff] %vm320_vm4, %v690_v58  ;;  %v688_v59 = vpop.permute.xlu0 %687 }
 0x19d   :  { %694 = vst.msk [vmem:[#allocation2 + $0xd0] sm:$0xff] %vm320_vm4, %v688_v59 }
 0x19f   :  { %v699_v60 = vpop.permute.xlu1 %698 }
 0x1a0   :  { %704 = vst.msk [vmem:[#allocation2 + $0xe8] sm:$0xff] %vm320_vm4, %v699_v60  ;;  %v697_v61 = vpop.permute.xlu0 %696 }
 0x1a1   :  { %703 = vst.msk [vmem:[#allocation2 + $0xe0] sm:$0xff] %vm320_vm4, %v697_v61 }
 0x1a3   :  { %v708_v62 = vpop.permute.xlu1 %707 }
 0x1a4   :  { %713 = vst.msk [vmem:[#allocation2 + $0xf8] sm:$0xff] %vm320_vm4, %v708_v62  ;;  %v706_v63 = vpop.permute.xlu0 %705 }
 0x1a5   :  { %712 = vst.msk [vmem:[#allocation2 + $0xf0] sm:$0xff] %vm320_vm4, %v706_v63 }
 0x1da   :  { %v789_v0 = vpop.f32.mrf.mxu1 }
 0x1db   :  { %1184 = vmatmul.mubr.f32.vlgmr.msra.gmra.mxu1 %v789_v0 }
 0x1dc   :  { %v1150_v1 = vpop.f32.mrf.mxu1 }
 0x1dd   :  { %1209 = shalt.err (!%p1206_p4)
}
 0x1de   :  { %s1230_s10 = smov 128   ;;  %s1231_s11 = smov 8   ;;  %v925_v2 = vld [vmem:[%s1625_s5] ss:$0 sm:$0xff]  ;;  %vm886_vm6 = vcmask 140288  }
 0x1df   :  { %899 = dma.vmem_to_hbm [thread:$0]  %s894_s9, 4096, %s1626_s6, [#allocation3], %s1230_s10, %s1230_s10, %s1231_s11  }
 0x29b   :  { %v882_v3 = vpop.f32.mrf.mxu1 }
 0x29c   :  { %v883_v4 = vadd.f32 %v925_v2, %v882_v3 }
 0x29d   :  { %v1185_v5 = vpop.f32.mrf.mxu1 }
 0x29e   :  { %887 = vst.msk [vmem:[%s1627_s7] sm:$0x3] %vm886_vm6, %v883_v4 }
 0x29f   :  { %1218 = dma.done.wait [#allocation3], 4096  }
 0x2a0   :  { %1219 = vsyncadd [#allocation3], 4294963200 }
 0x2a1   :  { %907 = vsyncpa [#allocation3], 1 }

</bundles_post_ra>
